<compile_context>
chip_gen: v6e
topology: v6e:2x2x1
jax: 0.10.0
libtpu: 0.0.40
codegen_flags: <defaults>
</compile_context>

<pallas_src>
import jax
import jax.numpy as jnp
from jax import lax
from jax.experimental import pallas as pl
from jax.experimental.pallas import tpu as pltpu

_NEG_BIG = -1e30  # bias for padded output lanes -> exp() underflows to exactly 0


def _rnn_kernel(xT_ref, whx_ref, bh_ref, whhT_ref, wphT_ref, bo_ref, y_ref,
                inj_scr):
    """Full RNN unroll + final softmax in a single kernel invocation.

    Refs (all fully VMEM-resident, toy shapes):
      xT_ref   : (seq, batch_pad)            f32   x transposed, batch-padded
      whx_ref  : (1, hidden_pad)             f32   W_hx.T, lane-padded (zeros)
      bh_ref   : (1, hidden_pad)             f32   b_h.T,  lane-padded (zeros)
      whhT_ref : (hidden_pad, hidden_pad)    mxu   W_hh.T, zero-padded
      wphT_ref : (hidden_pad, out_pad)       mxu   W_ph.T, zero-padded
      bo_ref   : (1, out_pad)                f32   b_o.T, padded lanes = -1e30
      y_ref    : (batch_pad, out_pad)        f32   lane-dense softmax output
      inj_scr  : (seq, batch_pad, hidden_pad) f32  VMEM scratch for injections
    """
    seq_length, batch_pad = xT_ref.shape
    hidden_pad = whhT_ref.shape[0]

    # Per-timestep input injection, computed once in-kernel (VPU, off the
    # serial chain):  inj[t, b, h] = x[b, t] * W_hx[h, 0] + b_h[h, 0].
    xT = xT_ref[...]                                            # (seq, batch_pad)
    inj_scr[...] = (xT[:, :, None] * whx_ref[...][None, :, :]
                    + bh_ref[...][None, :, :])

    # Hoist the loop-invariant recurrence weight into registers once.
    whhT = whhT_ref[...]                                        # (hp, hp) mxu dtype
    mxu_dtype = whhT.dtype

    def step(t, h):
        # Serial dependence chain: MXU dot (bf16 operands, f32 accum) +
        # VPU add + EUP tanh (f32).
        pre = inj_scr[t] + jnp.dot(h.astype(mxu_dtype), whhT,
                                   preferred_element_type=jnp.float32)
        return jnp.tanh(pre)

    h0 = jnp.zeros((batch_pad, hidden_pad), jnp.float32)        # h_0 = 0
    unroll = True if seq_length <= 16 else 16                   # raised cap
    h_last = lax.fori_loop(0, seq_length, step, h0, unroll=unroll)

    # Output projection of the last hidden state + softmax over output lanes.
    # Padded lanes have bias -1e30 (f32) -> exp == 0, normalization exact.
    logits = jnp.dot(h_last.astype(wphT_ref.dtype), wphT_ref[...],
                     preferred_element_type=jnp.float32) + bo_ref[...]
    m = jnp.max(logits, axis=-1, keepdims=True)
    e = jnp.exp(logits - m)
    denom = jnp.sum(e, axis=-1, keepdims=True)
    y_ref[...] = e / denom                 # exact divide (one-time epilogue op)


def vanilla_rnn_forward(x, W_hx, W_hh, W_ph, b_h, b_o, *,
                        mxu_dtype=jnp.bfloat16):
    """x: (batch, seq_length) float32. Parameters in PyTorch shapes:
       W_hx (hidden, 1), W_hh (hidden, hidden), W_ph (output, hidden),
       b_h (hidden, 1), b_o (output, 1). Returns y: (batch, output).

    mxu_dtype: dtype of the matmul operands (bf16 default; f32 for exact)."""
    batch, seq_length = x.shape
    hidden_dim = W_hh.shape[0]
    output_dim = W_ph.shape[0]

    f32 = jnp.float32
    hidden_pad = pl.cdiv(hidden_dim, 128) * 128                 # lane-dense hidden
    out_pad = pl.cdiv(output_dim, 128) * 128                    # lane-dense output
    sub = 16 if mxu_dtype == jnp.bfloat16 else 8                # sublane tile
    batch_pad = pl.cdiv(batch, sub) * sub

    # x transposed to (seq, batch_pad); padded batch columns are zero (their
    # rows are computed but sliced away).
    xT = jnp.zeros((seq_length, batch_pad), f32)
    xT = xT.at[:, :batch].set(x.T.astype(f32))

    # Lane-padded parameter slabs (zero padding is numerically exact).
    whx = jnp.zeros((1, hidden_pad), f32).at[:, :hidden_dim].set(
        W_hx.astype(f32).T)                                     # (1, hidden_pad)
    bh = jnp.zeros((1, hidden_pad), f32).at[:, :hidden_dim].set(
        b_h.astype(f32).T)                                      # (1, hidden_pad)
    whhT = jnp.zeros((hidden_pad, hidden_pad), f32).at[
        :hidden_dim, :hidden_dim].set(W_hh.astype(f32).T).astype(mxu_dtype)
    wphT = jnp.zeros((hidden_pad, out_pad), f32).at[
        :hidden_dim, :output_dim].set(W_ph.astype(f32).T).astype(mxu_dtype)
    # Padded output lanes get bias -1e30 so they vanish under softmax.
    bo = jnp.full((1, out_pad), _NEG_BIG, f32).at[:, :output_dim].set(
        b_o.astype(f32).T)

    vmem = pl.BlockSpec(memory_space=pltpu.MemorySpace.VMEM)
    y_full = pl.pallas_call(
        _rnn_kernel,
        out_shape=jax.ShapeDtypeStruct((batch_pad, out_pad), f32),
        in_specs=[vmem] * 6,
        out_specs=vmem,
        scratch_shapes=[pltpu.VMEM((seq_length, batch_pad, hidden_pad), f32)],
    )(xT, whx, bh, whhT, wphT, bo)

    return y_full[:batch, :output_dim]


def _xavier_uniform(key, shape):
    fan_out, fan_in = shape
    bound = (6.0 / (fan_in + fan_out)) ** 0.5
    return jax.random.uniform(key, shape, jnp.float32, -bound, bound)


def _reference_forward(x, W_hx, W_hh, W_ph, b_h, b_o):
    """Pure-JAX replica of the PyTorch forward, column-major like the module."""
    batch, seq_length = x.shape
    hidden_dim = W_hh.shape[0]
    h = jnp.zeros((hidden_dim, batch), jnp.float32)
    o = None
    for t in range(seq_length):
        x_t = x[:, t].reshape(1, -1)                            # (1, batch)
        h = jnp.tanh(W_hx @ x_t + W_hh @ h + b_h)               # (hidden, batch)
        o = W_ph @ h + b_o                                      # (output, batch)
    return jax.nn.softmax(o.T, axis=-1)                         # (batch, output)


if __name__ == "__main__":
    # Small shapes consistent with the module: x is (batch, seq), input_dim == 1.
    batch_size, seq_length, hidden_dim, output_dim = 8, 8, 32, 10

    key = jax.random.PRNGKey(0)
    k_x, k_whx, k_whh, k_wph = jax.random.split(key, 4)

    x = jax.random.normal(k_x, (batch_size, seq_length), jnp.float32)
    W_hx = _xavier_uniform(k_whx, (hidden_dim, 1))
    W_hh = _xavier_uniform(k_whh, (hidden_dim, hidden_dim))
    W_ph = _xavier_uniform(k_wph, (output_dim, hidden_dim))
    b_h = jnp.zeros((hidden_dim, 1), jnp.float32)
    b_o = jnp.zeros((output_dim, 1), jnp.float32)

    y_ref = _reference_forward(x, W_hx, W_hh, W_ph, b_h, b_o)

    # Exact-path check (f32 MXU operands): tight tolerance.
    y_f32 = vanilla_rnn_forward(x, W_hx, W_hh, W_ph, b_h, b_o,
                                mxu_dtype=jnp.float32)
    y_f32 = jax.block_until_ready(y_f32)
    assert y_f32.shape == (batch_size, output_dim)
    assert jnp.allclose(jnp.sum(y_f32, axis=-1), 1.0, atol=1e-5)
    assert jnp.allclose(y_f32, y_ref, atol=1e-4, rtol=1e-4)

    # Default fast path (bf16 MXU operands on the serial recurrence chain):
    # rows still sum to 1 exactly (f32 softmax, exact divide); probabilities
    # match the f32 reference within bf16-operand rounding of the recurrence.
    y = vanilla_rnn_forward(x, W_hx, W_hh, W_ph, b_h, b_o)
    y = jax.block_until_ready(y)
    assert y.shape == (batch_size, output_dim)
    assert jnp.allclose(jnp.sum(y, axis=-1), 1.0, atol=1e-5)
    assert jnp.allclose(y, y_ref, atol=3e-2)

    print("KERNEL_OK")
</pallas_src>

<mosaic_0001>
module attributes {stable_mosaic.version = 11 : i64} {
  func.func @_rnn_kernel(%arg0: memref<8x8xf32, #tpu.memory_space<vmem>>, %arg1: memref<1x128xf32, #tpu.memory_space<vmem>>, %arg2: memref<1x128xf32, #tpu.memory_space<vmem>>, %arg3: memref<128x128xf32, #tpu.memory_space<vmem>>, %arg4: memref<128x128xf32, #tpu.memory_space<vmem>>, %arg5: memref<1x128xf32, #tpu.memory_space<vmem>>, %arg6: memref<8x128xf32, #tpu.memory_space<vmem>>, %arg7: memref<8x8x128xf32, #tpu.memory_space<vmem>>) attributes {dimension_semantics = [], scalar_prefetch = 0 : i64, scratch_operands = 1 : i64, tpu.core_type = #tpu.core_type<tc>} {
    %c0 = arith.constant 0 : index
    %c0_0 = arith.constant 0 : index
    %0 = vector.load %arg0[%c0, %c0_0] : memref<8x8xf32, #tpu.memory_space<vmem>>, vector<8x8xf32>
    %1 = vector.shape_cast %0 : vector<8x8xf32> to vector<8x8x1xf32>
    %c0_1 = arith.constant 0 : index
    %c0_2 = arith.constant 0 : index
    %2 = vector.load %arg1[%c0_1, %c0_2] : memref<1x128xf32, #tpu.memory_space<vmem>>, vector<1x128xf32>
    %3 = vector.shape_cast %2 : vector<1x128xf32> to vector<1x1x128xf32>
    %4 = vector.broadcast %1 : vector<8x8x1xf32> to vector<8x8x128xf32>
    %5 = vector.broadcast %3 : vector<1x1x128xf32> to vector<8x8x128xf32>
    %6 = arith.mulf %4, %5 : vector<8x8x128xf32>
    %c0_3 = arith.constant 0 : index
    %c0_4 = arith.constant 0 : index
    %7 = vector.load %arg2[%c0_3, %c0_4] : memref<1x128xf32, #tpu.memory_space<vmem>>, vector<1x128xf32>
    %8 = vector.shape_cast %7 : vector<1x128xf32> to vector<1x1x128xf32>
    %9 = vector.broadcast %8 : vector<1x1x128xf32> to vector<8x8x128xf32>
    %10 = arith.addf %6, %9 : vector<8x8x128xf32>
    %c0_5 = arith.constant 0 : index
    %c0_6 = arith.constant 0 : index
    %c0_7 = arith.constant 0 : index
    %11 = vector.load %arg7[%c0_5, %c0_6, %c0_7] : memref<8x8x128xf32, #tpu.memory_space<vmem>>, vector<8x8x128xf32>
    tpu.vector_store %arg7[%c0_5, %c0_6, %c0_7], %10 {strides = array<i32>} : memref<8x8x128xf32, #tpu.memory_space<vmem>>, vector<8x8x128xf32>,
    %c0_8 = arith.constant 0 : index
    %c0_9 = arith.constant 0 : index
    %12 = vector.load %arg3[%c0_8, %c0_9] : memref<128x128xf32, #tpu.memory_space<vmem>>, vector<128x128xf32>
    %cst = arith.constant 0.000000e+00 : f32
    %13 = vector.broadcast %cst : f32 to vector<8x128xf32>
    %c0_i32 = arith.constant 0 : i32
    %14 = arith.index_cast %c0_i32 : i32 to index
    %c0_10 = arith.constant 0 : index
    %c0_11 = arith.constant 0 : index
    %15 = vector.load %arg7[%14, %c0_10, %c0_11] : memref<8x8x128xf32, #tpu.memory_space<vmem>>, vector<1x8x128xf32>
    %16 = vector.shape_cast %15 : vector<1x8x128xf32> to vector<8x128xf32>
    %cst_12 = arith.constant dense<0.000000e+00> : vector<8x128xf32>
    %17 = tpu.matmul %13, %12, %cst_12 {dimension_numbers = #tpu.dot_dimension_numbers<[1], [0], [0], [1], [0, 0, 1, 1], [], []>} : vector<8x128xf32>, vector<128x128xf32>, vector<8x128xf32> -> vector<8x128xf32>
    %18 = arith.addf %16, %17 : vector<8x128xf32>
    %19 = math.tanh %18 : vector<8x128xf32>
    %c1_i32 = arith.constant 1 : i32
    %20 = arith.index_cast %c1_i32 : i32 to index
    %c0_13 = arith.constant 0 : index
    %c0_14 = arith.constant 0 : index
    %21 = vector.load %arg7[%20, %c0_13, %c0_14] : memref<8x8x128xf32, #tpu.memory_space<vmem>>, vector<1x8x128xf32>
    %22 = vector.shape_cast %21 : vector<1x8x128xf32> to vector<8x128xf32>
    %cst_15 = arith.constant dense<0.000000e+00> : vector<8x128xf32>
    %23 = tpu.matmul %19, %12, %cst_15 {dimension_numbers = #tpu.dot_dimension_numbers<[1], [0], [0], [1], [0, 0, 1, 1], [], []>} : vector<8x128xf32>, vector<128x128xf32>, vector<8x128xf32> -> vector<8x128xf32>
    %24 = arith.addf %22, %23 : vector<8x128xf32>
    %25 = math.tanh %24 : vector<8x128xf32>
    %c2_i32 = arith.constant 2 : i32
    %26 = arith.index_cast %c2_i32 : i32 to index
    %c0_16 = arith.constant 0 : index
    %c0_17 = arith.constant 0 : index
    %27 = vector.load %arg7[%26, %c0_16, %c0_17] : memref<8x8x128xf32, #tpu.memory_space<vmem>>, vector<1x8x128xf32>
    %28 = vector.shape_cast %27 : vector<1x8x128xf32> to vector<8x128xf32>
    %cst_18 = arith.constant dense<0.000000e+00> : vector<8x128xf32>
    %29 = tpu.matmul %25, %12, %cst_18 {dimension_numbers = #tpu.dot_dimension_numbers<[1], [0], [0], [1], [0, 0, 1, 1], [], []>} : vector<8x128xf32>, vector<128x128xf32>, vector<8x128xf32> -> vector<8x128xf32>
    %30 = arith.addf %28, %29 : vector<8x128xf32>
    %31 = math.tanh %30 : vector<8x128xf32>
    %c3_i32 = arith.constant 3 : i32
    %32 = arith.index_cast %c3_i32 : i32 to index
    %c0_19 = arith.constant 0 : index
    %c0_20 = arith.constant 0 : index
    %33 = vector.load %arg7[%32, %c0_19, %c0_20] : memref<8x8x128xf32, #tpu.memory_space<vmem>>, vector<1x8x128xf32>
    %34 = vector.shape_cast %33 : vector<1x8x128xf32> to vector<8x128xf32>
    %cst_21 = arith.constant dense<0.000000e+00> : vector<8x128xf32>
    %35 = tpu.matmul %31, %12, %cst_21 {dimension_numbers = #tpu.dot_dimension_numbers<[1], [0], [0], [1], [0, 0, 1, 1], [], []>} : vector<8x128xf32>, vector<128x128xf32>, vector<8x128xf32> -> vector<8x128xf32>
    %36 = arith.addf %34, %35 : vector<8x128xf32>
    %37 = math.tanh %36 : vector<8x128xf32>
    %c4_i32 = arith.constant 4 : i32
    %38 = arith.index_cast %c4_i32 : i32 to index
    %c0_22 = arith.constant 0 : index
    %c0_23 = arith.constant 0 : index
    %39 = vector.load %arg7[%38, %c0_22, %c0_23] : memref<8x8x128xf32, #tpu.memory_space<vmem>>, vector<1x8x128xf32>
    %40 = vector.shape_cast %39 : vector<1x8x128xf32> to vector<8x128xf32>
    %cst_24 = arith.constant dense<0.000000e+00> : vector<8x128xf32>
    %41 = tpu.matmul %37, %12, %cst_24 {dimension_numbers = #tpu.dot_dimension_numbers<[1], [0], [0], [1], [0, 0, 1, 1], [], []>} : vector<8x128xf32>, vector<128x128xf32>, vector<8x128xf32> -> vector<8x128xf32>
    %42 = arith.addf %40, %41 : vector<8x128xf32>
    %43 = math.tanh %42 : vector<8x128xf32>
    %c5_i32 = arith.constant 5 : i32
    %44 = arith.index_cast %c5_i32 : i32 to index
    %c0_25 = arith.constant 0 : index
    %c0_26 = arith.constant 0 : index
    %45 = vector.load %arg7[%44, %c0_25, %c0_26] : memref<8x8x128xf32, #tpu.memory_space<vmem>>, vector<1x8x128xf32>
    %46 = vector.shape_cast %45 : vector<1x8x128xf32> to vector<8x128xf32>
    %cst_27 = arith.constant dense<0.000000e+00> : vector<8x128xf32>
    %47 = tpu.matmul %43, %12, %cst_27 {dimension_numbers = #tpu.dot_dimension_numbers<[1], [0], [0], [1], [0, 0, 1, 1], [], []>} : vector<8x128xf32>, vector<128x128xf32>, vector<8x128xf32> -> vector<8x128xf32>
    %48 = arith.addf %46, %47 : vector<8x128xf32>
    %49 = math.tanh %48 : vector<8x128xf32>
    %c6_i32 = arith.constant 6 : i32
    %50 = arith.index_cast %c6_i32 : i32 to index
    %c0_28 = arith.constant 0 : index
    %c0_29 = arith.constant 0 : index
    %51 = vector.load %arg7[%50, %c0_28, %c0_29] : memref<8x8x128xf32, #tpu.memory_space<vmem>>, vector<1x8x128xf32>
    %52 = vector.shape_cast %51 : vector<1x8x128xf32> to vector<8x128xf32>
    %cst_30 = arith.constant dense<0.000000e+00> : vector<8x128xf32>
    %53 = tpu.matmul %49, %12, %cst_30 {dimension_numbers = #tpu.dot_dimension_numbers<[1], [0], [0], [1], [0, 0, 1, 1], [], []>} : vector<8x128xf32>, vector<128x128xf32>, vector<8x128xf32> -> vector<8x128xf32>
    %54 = arith.addf %52, %53 : vector<8x128xf32>
    %55 = math.tanh %54 : vector<8x128xf32>
    %c7_i32 = arith.constant 7 : i32
    %56 = arith.index_cast %c7_i32 : i32 to index
    %c0_31 = arith.constant 0 : index
    %c0_32 = arith.constant 0 : index
    %57 = vector.load %arg7[%56, %c0_31, %c0_32] : memref<8x8x128xf32, #tpu.memory_space<vmem>>, vector<1x8x128xf32>
    %58 = vector.shape_cast %57 : vector<1x8x128xf32> to vector<8x128xf32>
    %cst_33 = arith.constant dense<0.000000e+00> : vector<8x128xf32>
    %59 = tpu.matmul %55, %12, %cst_33 {dimension_numbers = #tpu.dot_dimension_numbers<[1], [0], [0], [1], [0, 0, 1, 1], [], []>} : vector<8x128xf32>, vector<128x128xf32>, vector<8x128xf32> -> vector<8x128xf32>
    %60 = arith.addf %58, %59 : vector<8x128xf32>
    %61 = math.tanh %60 : vector<8x128xf32>
    %c8_i32 = arith.constant 8 : i32
    %c0_34 = arith.constant 0 : index
    %c0_35 = arith.constant 0 : index
    %62 = vector.load %arg4[%c0_34, %c0_35] : memref<128x128xf32, #tpu.memory_space<vmem>>, vector<128x128xf32>
    %cst_36 = arith.constant dense<0.000000e+00> : vector<8x128xf32>
    %63 = tpu.matmul %61, %62, %cst_36 {dimension_numbers = #tpu.dot_dimension_numbers<[1], [0], [0], [1], [0, 0, 1, 1], [], []>} : vector<8x128xf32>, vector<128x128xf32>, vector<8x128xf32> -> vector<8x128xf32>
    %c0_37 = arith.constant 0 : index
    %c0_38 = arith.constant 0 : index
    %64 = vector.load %arg5[%c0_37, %c0_38] : memref<1x128xf32, #tpu.memory_space<vmem>>, vector<1x128xf32>
    %65 = vector.broadcast %64 : vector<1x128xf32> to vector<8x128xf32>
    %66 = arith.addf %63, %65 : vector<8x128xf32>
    %cst_39 = arith.constant dense<0xFF800000> : vector<8xf32>
    %67 = vector.multi_reduction <maximumf>, %66, %cst_39 [1] : vector<8x128xf32> to vector<8xf32>
    %68 = vector.shape_cast %67 : vector<8xf32> to vector<8x1xf32>
    %69 = vector.broadcast %68 : vector<8x1xf32> to vector<8x128xf32>
    %70 = arith.subf %66, %69 : vector<8x128xf32>
    %71 = math.exp %70 : vector<8x128xf32>
    %cst_40 = arith.constant dense<0.000000e+00> : vector<8xf32>
    %72 = vector.multi_reduction <add>, %71, %cst_40 [1] : vector<8x128xf32> to vector<8xf32>
    %73 = vector.shape_cast %72 : vector<8xf32> to vector<8x1xf32>
    %74 = vector.broadcast %73 : vector<8x1xf32> to vector<8x128xf32>
    %75 = arith.divf %71, %74 : vector<8x128xf32>
    %c0_41 = arith.constant 0 : index
    %c0_42 = arith.constant 0 : index
    %76 = vector.load %arg6[%c0_41, %c0_42] : memref<8x128xf32, #tpu.memory_space<vmem>>, vector<8x128xf32>
    tpu.vector_store %arg6[%c0_41, %c0_42], %75 {strides = array<i32>} : memref<8x128xf32, #tpu.memory_space<vmem>>, vector<8x128xf32>,
    return
  }
}

</mosaic_0001>

<bundles_post_ra>
// kernel: tpu_custom_call.1
= control target key start
LH: loop header
LB: loop body
LE: loop exit
PB: predicated region body
PF: predicated region fallthrough
CT: control target
= control target key end

     0   :  { %11 = vsyncpa [#allocation4], 0  ;;  %s1896_s0 = inlined_call_operand.hbm [shape: f32[8,8], index: 0, kind: input, shape index: {}]   ;;  %s1897_s1 = inlined_call_operand.vmem [shape: f32[1,128], index: 1, kind: input, shape index: {}]   ;;  %s1898_s2 = inlined_call_operand.vmem [shape: f32[1,128], index: 2, kind: input, shape index: {}]   ;;  %s1899_s3 = inlined_call_operand.hbm [shape: f32[128,128], index: 3, kind: input, shape index: {}]   ;;  %s1900_s4 = inlined_call_operand.hbm [shape: f32[128,128], index: 4, kind: input, shape index: {}]   ;;  %s1901_s5 = inlined_call_operand.vmem [shape: f32[1,128], index: 5, kind: input, shape index: {}]   ;;  %s1902_s6 = inlined_call_operand.hbm [shape: f32[8,128], index: 6, kind: output, shape index: {}]  }
   0x1   :  { %12 = vsyncpa [#allocation7], 0 }
   0x2   :  { %13 = vsyncpa [#allocation5], 0  ;;  %s1469_s21 = smov [#allocation6]  }
   0x3   :  { %s33_s22 = sshll.u32 %s1469_s21, 4  ;;  %s34_s22 = int_to_ptr.vmem [resolvable:$true] %s33_s22 }
   0x4   :  { %s1391_s23 = scalar_lea.vmem %s34_s22, 2048  ;;  %p1396_p1 = scmp.lt.s32.totalorder %s34_s22, %s34_s22 }
   0x5   :  { %p1392_p0 = scmp.ne.s32.totalorder %s34_s22, %s1391_s23  ;;  %p1397_p2 = scmp.lt.s32.totalorder %s1391_s23, %s1391_s23 }
   0x7   :  { %p1398_p3 = por %p1397_p2, %p1396_p1 }
   0x9   :  { %p1399_p4 = pnand %p1398_p3, %p1392_p0 }
   0xb   :  { %1402 = shalt.err (!%p1399_p4)
}
   0xc   :  { %s1470_s24 = smov 128   ;;  %s1471_s25 = smov 8  }
   0xd   :  { %39 = dma.hbm_to_vmem [thread:$0]  %s1899_s3, 2048, %s34_s22, [#allocation7], %s1470_s24, %s1470_s24, %s1471_s25  }
   0xe   :  { %s1472_s28 = smov [#allocation3]   ;;  %s1473_s30 = smov [#allocation8]  }
   0xf   :  { %s20_s29 = sshll.u32 %s1472_s28, 4  ;;  %s45_s7 = sshll.u32 %s1473_s30, 4  ;;  %s21_s29 = int_to_ptr.vmem [resolvable:$true] %s20_s29  ;;  %s46_s7 = int_to_ptr.vmem [resolvable:$true] %s45_s7 }
  0x10   :  { %s1411_s8 = scalar_lea.vmem %s21_s29, 128  ;;  %p1416_p6 = scmp.lt.s32.totalorder %s21_s29, %s21_s29 }
  0x11   :  { %p1412_p5 = scmp.ne.s32.totalorder %s21_s29, %s1411_s8  ;;  %p1417_p7 = scmp.lt.s32.totalorder %s1411_s8, %s1411_s8 }
  0x13   :  { %p1418_p8 = por %p1417_p7, %p1416_p6 }
  0x15   :  { %p1419_p9 = pnand %p1418_p8, %p1412_p5 }
  0x17   :  { %1422 = shalt.err (!%p1419_p9)
}
  0x18   :  { %23 = dma.hbm_to_vmem [thread:$0]  %s1896_s0, 128, %s21_s29, [#allocation4]  }
  0x19   :  { %s1431_s11 = scalar_lea.vmem %s46_s7, 2048  ;;  %p1436_p11 = scmp.lt.s32.totalorder %s46_s7, %s46_s7 }
  0x1a   :  { %p1432_p10 = scmp.ne.s32.totalorder %s46_s7, %s1431_s11  ;;  %p1437_p12 = scmp.lt.s32.totalorder %s1431_s11, %s1431_s11 }
  0x1c   :  { %p1438_p13 = por %p1437_p12, %p1436_p11 }
  0x1e   :  { %p1439_p0 = pnand %p1438_p13, %p1432_p10 }
  0x20   :  { %1442 = shalt.err (!%p1439_p0)
}
  0x21   :  { %51 = dma.hbm_to_vmem [thread:$0]  %s1900_s4, 2048, %s46_s7, [#allocation7], %s1470_s24, %s1470_s24, %s1471_s25  }
  0x22   :  { %1463 = dma.done.wait [#allocation4], 128  }
  0x23   :  { %1464 = vsyncadd [#allocation4], 4294967168 }
  0x24   :  { %1465 = dma.done.wait [#allocation7], 4096  }
  0x25   :  { %1466 = vsyncadd [#allocation7], 4294963200  ;;  %v1474_v0 = vmov 0.0   ;;  %vm1475_vm0 = vmmov 0   ;;  %v64_v1 = vlaneseq  ;;  %v1529_v3 = vld [vmem:[#allocation6 + $0x78] sm:$0xff]  ;;  %v1531_v4 = vld [vmem:[#allocation6 + $0x70] sm:$0xff] }
  0x26   :  { %1040 = vmatprep.subr.mxu0 %v1474_v0  ;;  %1072 = vmatprep.mubr.msk.f32.mxu0 %vm1475_vm0, %v1474_v0  ;;  %v1536_v5 = vld [vmem:[#allocation6 + $0x68] sm:$0xff]  ;;  %v1543_v7 = vld [vmem:[#allocation6 + $0x60] sm:$0xff]  ;;  %v1547_v8 = vld [vmem:[#allocation3] sm:$0xff]  ;;  %s1476_s15 = smov [#allocation9]  }
  0x27   :  { %1075 = vmatprep.subr.mxu1 %v1474_v0  ;;  %1107 = vmatprep.mubr.msk.f32.mxu1 %vm1475_vm0, %v1474_v0  ;;  %v1527_v2 = vshrl.u32 %v64_v1, 7  ;;  %v1551_v9 = vld [vmem:[#allocation6 + $0x58] sm:$0xff]  ;;  %v1558_v11 = vld [vmem:[#allocation6 + $0x50] sm:$0xff]  ;;  %v1563_v12 = vld [vmem:[#allocation6 + $0x48] sm:$0xff]  ;;  %s874_s16 = sshll.u32 %s1476_s15, 4  ;;  %s875_s16 = int_to_ptr.vmem [resolvable:$true] %s874_s16 }
  0x28   :  { %1041 = vmatpush3.msra.mxu0 %v1529_v3  ;;  %1076 = vmatpush3.msra.mxu1 %v1529_v3  ;;  %v1569_v13 = vld [vmem:[#allocation6 + $0x40] sm:$0xff]  ;;  %v1575_v14 = vld [vmem:[#allocation6 + $0x38] sm:$0xff]  ;;  %v1581_v15 = vld [vmem:[#allocation6 + $0x30] sm:$0xff]  ;;  %s1443_s17 = scalar_lea.vmem %s875_s16, 128  ;;  %p1448_p2 = scmp.lt.s32.totalorder %s875_s16, %s875_s16 }
  0x29   :  { %1042 = vmatprep.subr.mxu0 %v1474_v0  ;;  %v66_v6 = vsub.s32 0, %v1527_v2  ;;  %1077 = vmatprep.subr.mxu1 %v1474_v0  ;;  %v1587_v16 = vld [vmem:[#allocation6 + $0x28] sm:$0xff]  ;;  %v1593_v17 = vld [vmem:[#allocation6 + $0x20] sm:$0xff]  ;;  %v1599_v18 = vld [vmem:[#allocation6 + $0x18] sm:$0xff]  ;;  %v73_v22 = vsub.s32 1, %v1527_v2  ;;  %v80_v33 = vsub.s32 2, %v1527_v2  ;;  %p1444_p1 = scmp.ne.s32.totalorder %s875_s16, %s1443_s17  ;;  %p1449_p3 = scmp.lt.s32.totalorder %s1443_s17, %s1443_s17 }
  0x2a   :  { %1043 = vmatpush3.msra.mxu0 %v1531_v4  ;;  %1078 = vmatpush3.msra.mxu1 %v1531_v4  ;;  %v1605_v19 = vld [vmem:[#allocation6 + $0x10] sm:$0xff]  ;;  %v1611_v20 = vld [vmem:[#allocation6 + $0x8] sm:$0xff]  ;;  %v1617_v21 = vld [vmem:[#allocation6] sm:$0xff]  ;;  %v87_v42 = vsub.s32 3, %v1527_v2  ;;  %v94_v51 = vsub.s32 4, %v1527_v2  ;;  %v101_v60 = vsub.s32 5, %v1527_v2 }
  0x2b   :  { %1044 = vmatprep.subr.mxu0 %v1474_v0  ;;  %1079 = vmatprep.subr.mxu1 %v1474_v0  ;;  %v67_v10 = vrot.slane %v1547_v8, %v66_v6  ;;  %v74_v23 = vrot.slane %v1547_v8, %v73_v22  ;;  %v1669_v24 = vld [vmem:[%s1897_s1] ss:$0 sm:$0xff]  ;;  %v81_v34 = vrot.slane %v1547_v8, %v80_v33  ;;  %v773_v33 = vld [vmem:[#allocation8 + $0x40] sm:$0xff]  ;;  %p1450_p4 = por %p1449_p3, %p1448_p2 }
  0x2c   :  { %1045 = vmatpush3.msra.mxu0 %v1536_v5  ;;  %1080 = vmatpush3.msra.mxu1 %v1536_v5  ;;  %v1675_v27 = vld [vmem:[%s1898_s2] ss:$0 sm:$0xff]  ;;  %v88_v43 = vrot.slane %v1547_v8, %v87_v42  ;;  %v95_v52 = vrot.slane %v1547_v8, %v94_v51  ;;  %v102_v61 = vrot.slane %v1547_v8, %v101_v60 }
  0x2d   :  { %1046 = vmatprep.subr.mxu0 %v1474_v0  ;;  %1081 = vmatprep.subr.mxu1 %v1474_v0  ;;  %p1451_p5 = pnand %p1450_p4, %p1444_p1 }
  0x2e   :  { %1047 = vmatpush3.msra.mxu0 %v1543_v7  ;;  %1082 = vmatpush3.msra.mxu1 %v1543_v7 }
  0x2f   :  { %1048 = vmatprep.subr.mxu0 %v1474_v0  ;;  %69 = vbcast.lane.b32.xlu0 %v67_v10, 256 }
  0x30   :  { %1049 = vmatpush3.msra.mxu0 %v1551_v9  ;;  %1083 = vmatprep.subr.mxu1 %v1474_v0 }
  0x31   :  { %1050 = vmatprep.subr.mxu0 %v1474_v0  ;;  %1084 = vmatpush3.msra.mxu1 %v1551_v9 }
  0x32   :  { %1051 = vmatpush3.msra.mxu0 %v1558_v11  ;;  %1085 = vmatprep.subr.mxu1 %v1474_v0 }
  0x33   :  { %1052 = vmatprep.subr.mxu0 %v1474_v0  ;;  %1086 = vmatpush3.msra.mxu1 %v1558_v11 }
  0x34   :  { %1053 = vmatpush3.msra.mxu0 %v1563_v12  ;;  %1087 = vmatprep.subr.mxu1 %v1474_v0 }
  0x35   :  { %1054 = vmatprep.subr.mxu0 %v1474_v0  ;;  %1088 = vmatpush3.msra.mxu1 %v1563_v12 }
  0x36   :  { %1055 = vmatpush3.msra.mxu0 %v1569_v13  ;;  %1089 = vmatprep.subr.mxu1 %v1474_v0 }
  0x37   :  { %1056 = vmatprep.subr.mxu0 %v1474_v0  ;;  %1090 = vmatpush3.msra.mxu1 %v1569_v13 }
  0x38   :  { %1057 = vmatpush3.msra.mxu0 %v1575_v14  ;;  %1091 = vmatprep.subr.mxu1 %v1474_v0 }
  0x39   :  { %1058 = vmatprep.subr.mxu0 %v1474_v0  ;;  %1092 = vmatpush3.msra.mxu1 %v1575_v14 }
  0x3a   :  { %1059 = vmatpush3.msra.mxu0 %v1581_v15  ;;  %1093 = vmatprep.subr.mxu1 %v1474_v0 }
  0x3b   :  { %1060 = vmatprep.subr.mxu0 %v1474_v0  ;;  %1094 = vmatpush3.msra.mxu1 %v1581_v15 }
  0x3c   :  { %1061 = vmatpush3.msra.mxu0 %v1587_v16  ;;  %1095 = vmatprep.subr.mxu1 %v1474_v0 }
  0x3d   :  { %1062 = vmatprep.subr.mxu0 %v1474_v0  ;;  %1096 = vmatpush3.msra.mxu1 %v1587_v16 }
  0x3e   :  { %1063 = vmatpush3.msra.mxu0 %v1593_v17  ;;  %1097 = vmatprep.subr.mxu1 %v1474_v0 }
  0x3f   :  { %1064 = vmatprep.subr.mxu0 %v1474_v0  ;;  %1098 = vmatpush3.msra.mxu1 %v1593_v17 }
  0x40   :  { %1065 = vmatpush3.msra.mxu0 %v1599_v18  ;;  %1099 = vmatprep.subr.mxu1 %v1474_v0 }
  0x41   :  { %1066 = vmatprep.subr.mxu0 %v1474_v0  ;;  %1100 = vmatpush3.msra.mxu1 %v1599_v18 }
  0x42   :  { %1067 = vmatpush3.msra.mxu0 %v1605_v19  ;;  %1101 = vmatprep.subr.mxu1 %v1474_v0 }
  0x43   :  { %1068 = vmatprep.subr.mxu0 %v1474_v0  ;;  %1102 = vmatpush3.msra.mxu1 %v1605_v19 }
  0x44   :  { %1069 = vmatpush3.msra.mxu0 %v1611_v20  ;;  %1103 = vmatprep.subr.mxu1 %v1474_v0 }
  0x45   :  { %1070 = vmatprep.subr.mxu0 %v1474_v0  ;;  %1104 = vmatpush3.msra.mxu1 %v1611_v20 }
  0x46   :  { %1071 = vmatpush3.msra.mxu0 %v1617_v21  ;;  %1105 = vmatprep.subr.mxu1 %v1474_v0 }
  0x47   :  { %1073 = vmatmul.mubr.f32.vlgmr.msra.gmra.mxu0 %v1474_v0  ;;  %1106 = vmatpush3.msra.mxu1 %v1617_v21 }
  0x48   :  { %1110 = vmatprep.subr.mxu0 %v1474_v0  ;;  %1142 = vmatprep.mubr.msk.f32.mxu0 %vm1475_vm0, %v1474_v0 }
  0x49   :  { %1111 = vmatpush3.msra.mxu0 %v1529_v3  ;;  %1145 = vmatprep.subr.mxu1 %v1474_v0 }
  0x4a   :  { %1112 = vmatprep.subr.mxu0 %v1474_v0  ;;  %76 = vbcast.lane.b32.xlu0 %v74_v23, 256 }
  0x4b   :  { %1113 = vmatpush3.msra.mxu0 %v1531_v4  ;;  %83 = vbcast.lane.b32.xlu1 %v81_v34, 256  ;;  %v772_v34 = vld [vmem:[#allocation8 + $0x38] sm:$0xff] }
  0x4c   :  { %1114 = vmatprep.subr.mxu0 %v1474_v0 }
  0x4d   :  { %1115 = vmatpush3.msra.mxu0 %v1536_v5 }
  0x4e   :  { %1116 = vmatprep.subr.mxu0 %v1474_v0  ;;  %97 = vbcast.lane.b32.xlu0 %v95_v52, 256 }
  0x4f   :  { %1117 = vmatpush3.msra.mxu0 %v1543_v7  ;;  %90 = vbcast.lane.b32.xlu1 %v88_v43, 256 }
  0x50   :  { %1118 = vmatprep.subr.mxu0 %v1474_v0 }
  0x51   :  { %1119 = vmatpush3.msra.mxu0 %v1551_v9 }
  0x52   :  { %1120 = vmatprep.subr.mxu0 %v1474_v0 }
  0x53   :  { %1121 = vmatpush3.msra.mxu0 %v1558_v11  ;;  %104 = vbcast.lane.b32.xlu1 %v102_v61, 256 }
  0x54   :  { %1122 = vmatprep.subr.mxu0 %v1474_v0 }
  0x55   :  { %1123 = vmatpush3.msra.mxu0 %v1563_v12 }
  0x56   :  { %1124 = vmatprep.subr.mxu0 %v1474_v0 }
  0x57   :  { %1125 = vmatpush3.msra.mxu0 %v1569_v13 }
  0x58   :  { %1126 = vmatprep.subr.mxu0 %v1474_v0 }
  0x59   :  { %1127 = vmatpush3.msra.mxu0 %v1575_v14 }
  0x5a   :  { %1128 = vmatprep.subr.mxu0 %v1474_v0 }
  0x5b   :  { %1129 = vmatpush3.msra.mxu0 %v1581_v15 }
  0x5c   :  { %1130 = vmatprep.subr.mxu0 %v1474_v0 }
  0x5d   :  { %1131 = vmatpush3.msra.mxu0 %v1587_v16 }
  0x5e   :  { %1132 = vmatprep.subr.mxu0 %v1474_v0 }
  0x5f   :  { %1133 = vmatpush3.msra.mxu0 %v1593_v17 }
  0x60   :  { %1134 = vmatprep.subr.mxu0 %v1474_v0 }
  0x61   :  { %1135 = vmatpush3.msra.mxu0 %v1599_v18 }
  0x62   :  { %1136 = vmatprep.subr.mxu0 %v1474_v0 }
  0x63   :  { %1137 = vmatpush3.msra.mxu0 %v1605_v19 }
  0x64   :  { %1138 = vmatprep.subr.mxu0 %v1474_v0 }
  0x65   :  { %1139 = vmatpush3.msra.mxu0 %v1611_v20 }
  0x66   :  { %1140 = vmatprep.subr.mxu0 %v1474_v0 }
  0x67   :  { %1141 = vmatpush3.msra.mxu0 %v1617_v21 }
  0x68   :  { %1180 = vmatprep.subr.mxu0 %v1474_v0 }
  0xa1   :  { %v70_v25 = vpop.permute.xlu0 %69 }
  0xa2   :  { %v127_v26 = vmul.f32 %v1669_v24, %v70_v25 }
  0xa4   :  { %v142_v28 = vadd.f32 %v1675_v27, %v127_v26 }
  0xbc   :  { %v77_v35 = vpop.permute.xlu0 %76 }
  0xbd   :  { %v128_v36 = vmul.f32 %v1669_v24, %v77_v35  ;;  %v84_v44 = vpop.permute.xlu1 %83  ;;  %v771_v35 = vld [vmem:[#allocation8 + $0x30] sm:$0xff] }
  0xbe   :  { %v129_v45 = vmul.f32 %v1669_v24, %v84_v44 }
  0xbf   :  { %v143_v37 = vadd.f32 %v1675_v27, %v128_v36  ;;  %v770_v36 = vld [vmem:[#allocation8 + $0x28] sm:$0xff] }
  0xc0   :  { %v144_v46 = vadd.f32 %v1675_v27, %v129_v45  ;;  %v98_v62 = vpop.permute.xlu0 %97 }
  0xc1   :  { %v91_v53 = vpop.permute.xlu1 %90  ;;  %v131_v63 = vmul.f32 %v1669_v24, %v98_v62 }
  0xc2   :  { %v130_v54 = vmul.f32 %v1669_v24, %v91_v53 }
  0xc3   :  { %v146_v1 = vadd.f32 %v1675_v27, %v131_v63 }
  0xc4   :  { %v145_v55 = vadd.f32 %v1675_v27, %v130_v54 }
 0x107   :  { %v241_v29 = vpop.f32.mrf.mxu0 }
 0x108   :  { %v245_v30 = vadd.f32 %v241_v29, %v142_v28 }
 0x109   :  { %v1074_v31 = vpop.f32.mrf.mxu0 }
 0x10a   :  { %1363 = vtanh.f32 %v245_v30 }
 0x117   :  { %v1364_v32 = vpop.eup %1363 }
 0x118   :  { %1108 = vmatmul.mubr.f32.vlgmr.msra.gmra.mxu1 %v1364_v32 }
 0x119   :  { %1146 = vmatpush3.msra.mxu1 %v1529_v3  ;;  %1177 = vmatprep.mubr.msk.f32.mxu1 %vm1475_vm0, %v1474_v0 }
 0x11a   :  { %1147 = vmatprep.subr.mxu1 %v1474_v0 }
 0x11b   :  { %1148 = vmatpush3.msra.mxu1 %v1531_v4 }
 0x11c   :  { %1149 = vmatprep.subr.mxu1 %v1474_v0 }
 0x11d   :  { %1150 = vmatpush3.msra.mxu1 %v1536_v5 }
 0x11e   :  { %1151 = vmatprep.subr.mxu1 %v1474_v0 }
 0x11f   :  { %1152 = vmatpush3.msra.mxu1 %v1543_v7 }
 0x120   :  { %1153 = vmatprep.subr.mxu1 %v1474_v0 }
 0x121   :  { %1154 = vmatpush3.msra.mxu1 %v1551_v9 }
 0x122   :  { %1155 = vmatprep.subr.mxu1 %v1474_v0 }
 0x123   :  { %1156 = vmatpush3.msra.mxu1 %v1558_v11 }
 0x124   :  { %1157 = vmatprep.subr.mxu1 %v1474_v0 }
 0x125   :  { %1158 = vmatpush3.msra.mxu1 %v1563_v12 }
 0x126   :  { %1159 = vmatprep.subr.mxu1 %v1474_v0 }
 0x127   :  { %1160 = vmatpush3.msra.mxu1 %v1569_v13 }
 0x128   :  { %1161 = vmatprep.subr.mxu1 %v1474_v0 }
 0x129   :  { %1162 = vmatpush3.msra.mxu1 %v1575_v14 }
 0x12a   :  { %1163 = vmatprep.subr.mxu1 %v1474_v0 }
 0x12b   :  { %1164 = vmatpush3.msra.mxu1 %v1581_v15 }
 0x12c   :  { %1165 = vmatprep.subr.mxu1 %v1474_v0 }
 0x12d   :  { %1166 = vmatpush3.msra.mxu1 %v1587_v16 }
 0x12e   :  { %1167 = vmatprep.subr.mxu1 %v1474_v0 }
 0x12f   :  { %1168 = vmatpush3.msra.mxu1 %v1593_v17 }
 0x130   :  { %1169 = vmatprep.subr.mxu1 %v1474_v0 }
 0x131   :  { %1170 = vmatpush3.msra.mxu1 %v1599_v18 }
 0x132   :  { %1171 = vmatprep.subr.mxu1 %v1474_v0 }
 0x133   :  { %1172 = vmatpush3.msra.mxu1 %v1605_v19 }
 0x134   :  { %1173 = vmatprep.subr.mxu1 %v1474_v0 }
 0x135   :  { %1174 = vmatpush3.msra.mxu1 %v1611_v20 }
 0x136   :  { %1175 = vmatprep.subr.mxu1 %v1474_v0 }
 0x137   :  { %1176 = vmatpush3.msra.mxu1 %v1617_v21 }
 0x138   :  { %1215 = vmatprep.subr.mxu1 %v1474_v0 }
 0x1d8   :  { %v315_v38 = vpop.f32.mrf.mxu1 }
 0x1d9   :  { %v319_v39 = vadd.f32 %v315_v38, %v143_v37  ;;  %v769_v37 = vld [vmem:[#allocation8 + $0x20] sm:$0xff]  ;;  %v768_v38 = vld [vmem:[#allocation8 + $0x18] sm:$0xff] }
 0x1da   :  { %v1109_v40 = vpop.f32.mrf.mxu1 }
 0x1db   :  { %1365 = vtanh.f32 %v319_v39  ;;  %v767_v39 = vld [vmem:[#allocation8 + $0x10] sm:$0xff]  ;;  %v766_v40 = vld [vmem:[#allocation8 + $0x8] sm:$0xff] }
 0x1e8   :  { %v1366_v41 = vpop.eup %1365 }
 0x1e9   :  { %1143 = vmatmul.mubr.f32.vlgmr.msra.gmra.mxu0 %v1366_v41  ;;  %v765_v41 = vld [vmem:[#allocation8] sm:$0xff] }
 0x1ea   :  { %1181 = vmatpush3.msra.mxu0 %v1529_v3  ;;  %1212 = vmatprep.mubr.msk.f32.mxu0 %vm1475_vm0, %v1474_v0 }
 0x1eb   :  { %1182 = vmatprep.subr.mxu0 %v1474_v0 }
 0x1ec   :  { %1183 = vmatpush3.msra.mxu0 %v1531_v4 }
 0x1ed   :  { %1184 = vmatprep.subr.mxu0 %v1474_v0 }
 0x1ee   :  { %1185 = vmatpush3.msra.mxu0 %v1536_v5 }
 0x1ef   :  { %1186 = vmatprep.subr.mxu0 %v1474_v0 }
 0x1f0   :  { %1187 = vmatpush3.msra.mxu0 %v1543_v7 }
 0x1f1   :  { %1188 = vmatprep.subr.mxu0 %v1474_v0 }
 0x1f2   :  { %1189 = vmatpush3.msra.mxu0 %v1551_v9 }
 0x1f3   :  { %1190 = vmatprep.subr.mxu0 %v1474_v0 }
 0x1f4   :  { %1191 = vmatpush3.msra.mxu0 %v1558_v11 }
 0x1f5   :  { %1192 = vmatprep.subr.mxu0 %v1474_v0 }
 0x1f6   :  { %1193 = vmatpush3.msra.mxu0 %v1563_v12 }
 0x1f7   :  { %1194 = vmatprep.subr.mxu0 %v1474_v0 }
 0x1f8   :  { %1195 = vmatpush3.msra.mxu0 %v1569_v13 }
 0x1f9   :  { %1196 = vmatprep.subr.mxu0 %v1474_v0 }
 0x1fa   :  { %1197 = vmatpush3.msra.mxu0 %v1575_v14 }
 0x1fb   :  { %1198 = vmatprep.subr.mxu0 %v1474_v0 }
 0x1fc   :  { %1199 = vmatpush3.msra.mxu0 %v1581_v15 }
 0x1fd   :  { %1200 = vmatprep.subr.mxu0 %v1474_v0 }
 0x1fe   :  { %1201 = vmatpush3.msra.mxu0 %v1587_v16 }
 0x1ff   :  { %1202 = vmatprep.subr.mxu0 %v1474_v0 }
 0x200   :  { %1203 = vmatpush3.msra.mxu0 %v1593_v17 }
 0x201   :  { %1204 = vmatprep.subr.mxu0 %v1474_v0 }
 0x202   :  { %1205 = vmatpush3.msra.mxu0 %v1599_v18 }
 0x203   :  { %1206 = vmatprep.subr.mxu0 %v1474_v0 }
 0x204   :  { %1207 = vmatpush3.msra.mxu0 %v1605_v19 }
 0x205   :  { %1208 = vmatprep.subr.mxu0 %v1474_v0 }
 0x206   :  { %1209 = vmatpush3.msra.mxu0 %v1611_v20 }
 0x207   :  { %1210 = vmatprep.subr.mxu0 %v1474_v0 }
 0x208   :  { %1211 = vmatpush3.msra.mxu0 %v1617_v21 }
 0x209   :  { %1250 = vmatprep.subr.mxu0 %v1474_v0 }
 0x2a9   :  { %v389_v47 = vpop.f32.mrf.mxu0 }
 0x2aa   :  { %v393_v48 = vadd.f32 %v389_v47, %v144_v46 }
 0x2ab   :  { %v1144_v49 = vpop.f32.mrf.mxu0 }
 0x2ac   :  { %1367 = vtanh.f32 %v393_v48  ;;  %v886_v49 = vld [vmem:[%s1901_s5] ss:$0 sm:$0xff] }
 0x2b9   :  { %v1368_v50 = vpop.eup %1367 }
 0x2ba   :  { %1178 = vmatmul.mubr.f32.vlgmr.msra.gmra.mxu1 %v1368_v50 }
 0x2bb   :  { %1216 = vmatpush3.msra.mxu1 %v1529_v3  ;;  %1247 = vmatprep.mubr.msk.f32.mxu1 %vm1475_vm0, %v1474_v0 }
 0x2bc   :  { %1217 = vmatprep.subr.mxu1 %v1474_v0 }
 0x2bd   :  { %1218 = vmatpush3.msra.mxu1 %v1531_v4 }
 0x2be   :  { %1219 = vmatprep.subr.mxu1 %v1474_v0 }
 0x2bf   :  { %1220 = vmatpush3.msra.mxu1 %v1536_v5 }
 0x2c0   :  { %1221 = vmatprep.subr.mxu1 %v1474_v0 }
 0x2c1   :  { %1222 = vmatpush3.msra.mxu1 %v1543_v7 }
 0x2c2   :  { %1223 = vmatprep.subr.mxu1 %v1474_v0 }
 0x2c3   :  { %1224 = vmatpush3.msra.mxu1 %v1551_v9 }
 0x2c4   :  { %1225 = vmatprep.subr.mxu1 %v1474_v0 }
 0x2c5   :  { %1226 = vmatpush3.msra.mxu1 %v1558_v11 }
 0x2c6   :  { %1227 = vmatprep.subr.mxu1 %v1474_v0 }
 0x2c7   :  { %1228 = vmatpush3.msra.mxu1 %v1563_v12 }
 0x2c8   :  { %1229 = vmatprep.subr.mxu1 %v1474_v0 }
 0x2c9   :  { %1230 = vmatpush3.msra.mxu1 %v1569_v13 }
 0x2ca   :  { %1231 = vmatprep.subr.mxu1 %v1474_v0 }
 0x2cb   :  { %1232 = vmatpush3.msra.mxu1 %v1575_v14 }
 0x2cc   :  { %1233 = vmatprep.subr.mxu1 %v1474_v0 }
 0x2cd   :  { %1234 = vmatpush3.msra.mxu1 %v1581_v15 }
 0x2ce   :  { %1235 = vmatprep.subr.mxu1 %v1474_v0 }
 0x2cf   :  { %1236 = vmatpush3.msra.mxu1 %v1587_v16 }
 0x2d0   :  { %1237 = vmatprep.subr.mxu1 %v1474_v0 }
 0x2d1   :  { %1238 = vmatpush3.msra.mxu1 %v1593_v17 }
 0x2d2   :  { %1239 = vmatprep.subr.mxu1 %v1474_v0 }
 0x2d3   :  { %1240 = vmatpush3.msra.mxu1 %v1599_v18 }
 0x2d4   :  { %1241 = vmatprep.subr.mxu1 %v1474_v0 }
 0x2d5   :  { %1242 = vmatpush3.msra.mxu1 %v1605_v19 }
 0x2d6   :  { %1243 = vmatprep.subr.mxu1 %v1474_v0 }
 0x2d7   :  { %1244 = vmatpush3.msra.mxu1 %v1611_v20 }
 0x2d8   :  { %1245 = vmatprep.subr.mxu1 %v1474_v0 }
 0x2d9   :  { %1246 = vmatpush3.msra.mxu1 %v1617_v21 }
 0x2da   :  { %1285 = vmatprep.subr.mxu1 %v1474_v0 }
 0x37a   :  { %v463_v56 = vpop.f32.mrf.mxu1 }
 0x37b   :  { %v467_v57 = vadd.f32 %v463_v56, %v145_v55 }
 0x37c   :  { %v1179_v58 = vpop.f32.mrf.mxu1 }
 0x37d   :  { %1369 = vtanh.f32 %v467_v57 }
 0x38a   :  { %v1370_v59 = vpop.eup %1369 }
 0x38b   :  { %1213 = vmatmul.mubr.f32.vlgmr.msra.gmra.mxu0 %v1370_v59 }
 0x38c   :  { %1251 = vmatpush3.msra.mxu0 %v1529_v3  ;;  %1282 = vmatprep.mubr.msk.f32.mxu0 %vm1475_vm0, %v1474_v0 }
 0x38d   :  { %1252 = vmatprep.subr.mxu0 %v1474_v0 }
 0x38e   :  { %1253 = vmatpush3.msra.mxu0 %v1531_v4 }
 0x38f   :  { %1254 = vmatprep.subr.mxu0 %v1474_v0 }
 0x390   :  { %1255 = vmatpush3.msra.mxu0 %v1536_v5 }
 0x391   :  { %1256 = vmatprep.subr.mxu0 %v1474_v0 }
 0x392   :  { %1257 = vmatpush3.msra.mxu0 %v1543_v7 }
 0x393   :  { %1258 = vmatprep.subr.mxu0 %v1474_v0 }
 0x394   :  { %1259 = vmatpush3.msra.mxu0 %v1551_v9 }
 0x395   :  { %1260 = vmatprep.subr.mxu0 %v1474_v0 }
 0x396   :  { %1261 = vmatpush3.msra.mxu0 %v1558_v11 }
 0x397   :  { %1262 = vmatprep.subr.mxu0 %v1474_v0 }
 0x398   :  { %1263 = vmatpush3.msra.mxu0 %v1563_v12 }
 0x399   :  { %1264 = vmatprep.subr.mxu0 %v1474_v0 }
 0x39a   :  { %1265 = vmatpush3.msra.mxu0 %v1569_v13 }
 0x39b   :  { %1266 = vmatprep.subr.mxu0 %v1474_v0 }
 0x39c   :  { %1267 = vmatpush3.msra.mxu0 %v1575_v14 }
 0x39d   :  { %1268 = vmatprep.subr.mxu0 %v1474_v0 }
 0x39e   :  { %1269 = vmatpush3.msra.mxu0 %v1581_v15 }
 0x39f   :  { %1270 = vmatprep.subr.mxu0 %v1474_v0 }
 0x3a0   :  { %1271 = vmatpush3.msra.mxu0 %v1587_v16 }
 0x3a1   :  { %1272 = vmatprep.subr.mxu0 %v1474_v0 }
 0x3a2   :  { %1273 = vmatpush3.msra.mxu0 %v1593_v17 }
 0x3a3   :  { %1274 = vmatprep.subr.mxu0 %v1474_v0 }
 0x3a4   :  { %1275 = vmatpush3.msra.mxu0 %v1599_v18 }
 0x3a5   :  { %1276 = vmatprep.subr.mxu0 %v1474_v0 }
 0x3a6   :  { %1277 = vmatpush3.msra.mxu0 %v1605_v19 }
 0x3a7   :  { %1278 = vmatprep.subr.mxu0 %v1474_v0 }
 0x3a8   :  { %1279 = vmatpush3.msra.mxu0 %v1611_v20 }
 0x3a9   :  { %1280 = vmatprep.subr.mxu0 %v1474_v0 }
 0x3aa   :  { %1281 = vmatpush3.msra.mxu0 %v1617_v21 }
 0x3ab   :  { %1320 = vmatprep.subr.mxu0 %v1474_v0 }
 0x44b   :  { %v537_v6 = vpop.f32.mrf.mxu0 }
 0x44c   :  { %v541_v10 = vadd.f32 %v537_v6, %v146_v1 }
 0x44d   :  { %v1214_v22 = vpop.f32.mrf.mxu0 }
 0x44e   :  { %1371 = vtanh.f32 %v541_v10 }
 0x45b   :  { %v1372_v23 = vpop.eup %1371 }
 0x45c   :  { %1248 = vmatmul.mubr.f32.vlgmr.msra.gmra.mxu1 %v1372_v23 }
 0x45d   :  { %1286 = vmatpush3.msra.mxu1 %v1529_v3  ;;  %1317 = vmatprep.mubr.msk.f32.mxu1 %vm1475_vm0, %v1474_v0  ;;  %v108_v3 = vsub.s32 6, %v1527_v2 }
 0x45e   :  { %1287 = vmatprep.subr.mxu1 %v1474_v0 }
 0x45f   :  { %1288 = vmatpush3.msra.mxu1 %v1531_v4  ;;  %v109_v4 = vrot.slane %v1547_v8, %v108_v3 }
 0x460   :  { %1289 = vmatprep.subr.mxu1 %v1474_v0 }
 0x461   :  { %1290 = vmatpush3.msra.mxu1 %v1536_v5  ;;  %111 = vbcast.lane.b32.xlu0 %v109_v4, 256  ;;  %v105_v5 = vpop.permute.xlu1 %104 }
 0x462   :  { %1291 = vmatprep.subr.mxu1 %v1474_v0 }
 0x463   :  { %1292 = vmatpush3.msra.mxu1 %v1543_v7  ;;  %v132_v7 = vmul.f32 %v1669_v24, %v105_v5 }
 0x464   :  { %1293 = vmatprep.subr.mxu1 %v1474_v0 }
 0x465   :  { %1294 = vmatpush3.msra.mxu1 %v1551_v9  ;;  %v147_v9 = vadd.f32 %v1675_v27, %v132_v7 }
 0x466   :  { %1295 = vmatprep.subr.mxu1 %v1474_v0 }
 0x467   :  { %1296 = vmatpush3.msra.mxu1 %v1558_v11 }
 0x468   :  { %1297 = vmatprep.subr.mxu1 %v1474_v0 }
 0x469   :  { %1298 = vmatpush3.msra.mxu1 %v1563_v12 }
 0x46a   :  { %1299 = vmatprep.subr.mxu1 %v1474_v0 }
 0x46b   :  { %1300 = vmatpush3.msra.mxu1 %v1569_v13 }
 0x46c   :  { %1301 = vmatprep.subr.mxu1 %v1474_v0 }
 0x46d   :  { %1302 = vmatpush3.msra.mxu1 %v1575_v14 }
 0x46e   :  { %1303 = vmatprep.subr.mxu1 %v1474_v0 }
 0x46f   :  { %1304 = vmatpush3.msra.mxu1 %v1581_v15  ;;  %v115_v15 = vsub.s32 7, %v1527_v2  ;;  %v775_v2 = vld [vmem:[#allocation8 + $0x50] sm:$0xff] }
 0x470   :  { %1305 = vmatprep.subr.mxu1 %v1474_v0 }
 0x471   :  { %1306 = vmatpush3.msra.mxu1 %v1587_v16  ;;  %v780_v16 = vld [vmem:[#allocation8 + $0x78] sm:$0xff] }
 0x472   :  { %1307 = vmatprep.subr.mxu1 %v1474_v0 }
 0x473   :  { %1308 = vmatpush3.msra.mxu1 %v1593_v17  ;;  %v779_v17 = vld [vmem:[#allocation8 + $0x70] sm:$0xff] }
 0x474   :  { %1309 = vmatprep.subr.mxu1 %v1474_v0 }
 0x475   :  { %1310 = vmatpush3.msra.mxu1 %v1599_v18  ;;  %v116_v18 = vrot.slane %v1547_v8, %v115_v15  ;;  %v774_v8 = vld [vmem:[#allocation8 + $0x48] sm:$0xff] }
 0x476   :  { %1311 = vmatprep.subr.mxu1 %v1474_v0 }
 0x477   :  { %1312 = vmatpush3.msra.mxu1 %v1605_v19  ;;  %v778_v19 = vld [vmem:[#allocation8 + $0x68] sm:$0xff]  ;;  %118 = vbcast.lane.b32.xlu1 %v116_v18, 256 }
 0x478   :  { %1313 = vmatprep.subr.mxu1 %v1474_v0 }
 0x479   :  { %1314 = vmatpush3.msra.mxu1 %v1611_v20  ;;  %v777_v20 = vld [vmem:[#allocation8 + $0x60] sm:$0xff] }
 0x47a   :  { %1315 = vmatprep.subr.mxu1 %v1474_v0 }
 0x47b   :  { %1316 = vmatpush3.msra.mxu1 %v1617_v21  ;;  %v776_v21 = vld [vmem:[#allocation8 + $0x58] sm:$0xff] }
 0x4d3   :  { %v112_v25 = vpop.permute.xlu0 %111 }
 0x4d4   :  { %v133_v26 = vmul.f32 %v1669_v24, %v112_v25 }
 0x4d6   :  { %v148_v28 = vadd.f32 %v1675_v27, %v133_v26 }
 0x4e9   :  { %v119_v42 = vpop.permute.xlu1 %118 }
 0x4ea   :  { %v134_v43 = vmul.f32 %v1669_v24, %v119_v42 }
 0x4ec   :  { %v149_v44 = vadd.f32 %v1675_v27, %v134_v43 }
 0x51c   :  { %v611_v11 = vpop.f32.mrf.mxu1 }
 0x51d   :  { %v615_v12 = vadd.f32 %v611_v11, %v147_v9 }
 0x51e   :  { %v1249_v13 = vpop.f32.mrf.mxu1 }
 0x51f   :  { %1373 = vtanh.f32 %v615_v12 }
 0x52c   :  { %v1374_v14 = vpop.eup %1373 }
 0x52d   :  { %1283 = vmatmul.mubr.f32.vlgmr.msra.gmra.mxu0 %v1374_v14 }
 0x52e   :  { %1352 = vmatprep.mubr.msk.f32.mxu0 %vm1475_vm0, %v1474_v0  ;;  %1321 = vmatpush3.msra.mxu0 %v780_v16 }
 0x52f   :  { %1322 = vmatprep.subr.mxu0 %v1474_v0 }
 0x530   :  { %1323 = vmatpush3.msra.mxu0 %v779_v17 }
 0x531   :  { %1324 = vmatprep.subr.mxu0 %v1474_v0 }
 0x532   :  { %1325 = vmatpush3.msra.mxu0 %v778_v19 }
 0x533   :  { %1326 = vmatprep.subr.mxu0 %v1474_v0 }
 0x534   :  { %1327 = vmatpush3.msra.mxu0 %v777_v20 }
 0x535   :  { %1328 = vmatprep.subr.mxu0 %v1474_v0 }
 0x536   :  { %1329 = vmatpush3.msra.mxu0 %v776_v21 }
 0x537   :  { %1330 = vmatprep.subr.mxu0 %v1474_v0 }
 0x538   :  { %1331 = vmatpush3.msra.mxu0 %v775_v2 }
 0x539   :  { %1332 = vmatprep.subr.mxu0 %v1474_v0 }
 0x53a   :  { %1333 = vmatpush3.msra.mxu0 %v774_v8 }
 0x53b   :  { %1334 = vmatprep.subr.mxu0 %v1474_v0 }
 0x53c   :  { %1335 = vmatpush3.msra.mxu0 %v773_v33 }
 0x53d   :  { %1336 = vmatprep.subr.mxu0 %v1474_v0 }
 0x53e   :  { %1337 = vmatpush3.msra.mxu0 %v772_v34 }
 0x53f   :  { %1338 = vmatprep.subr.mxu0 %v1474_v0 }
 0x540   :  { %1339 = vmatpush3.msra.mxu0 %v771_v35 }
 0x541   :  { %1340 = vmatprep.subr.mxu0 %v1474_v0 }
 0x542   :  { %1341 = vmatpush3.msra.mxu0 %v770_v36 }
 0x543   :  { %1342 = vmatprep.subr.mxu0 %v1474_v0 }
 0x544   :  { %1343 = vmatpush3.msra.mxu0 %v769_v37 }
 0x545   :  { %1344 = vmatprep.subr.mxu0 %v1474_v0 }
 0x546   :  { %1345 = vmatpush3.msra.mxu0 %v768_v38 }
 0x547   :  { %1346 = vmatprep.subr.mxu0 %v1474_v0 }
 0x548   :  { %1347 = vmatpush3.msra.mxu0 %v767_v39 }
 0x549   :  { %1348 = vmatprep.subr.mxu0 %v1474_v0 }
 0x54a   :  { %1349 = vmatpush3.msra.mxu0 %v766_v40 }
 0x54b   :  { %1350 = vmatprep.subr.mxu0 %v1474_v0 }
 0x54c   :  { %1351 = vmatpush3.msra.mxu0 %v765_v41 }
 0x5ed   :  { %v685_v29 = vpop.f32.mrf.mxu0 }
 0x5ee   :  { %v689_v30 = vadd.f32 %v685_v29, %v148_v28 }
 0x5ef   :  { %v1284_v31 = vpop.f32.mrf.mxu0 }
 0x5f0   :  { %1375 = vtanh.f32 %v689_v30 }
 0x5fd   :  { %v1376_v32 = vpop.eup %1375 }
 0x5fe   :  { %1318 = vmatmul.mubr.f32.vlgmr.msra.gmra.mxu1 %v1376_v32 }
 0x6be   :  { %v759_v45 = vpop.f32.mrf.mxu1 }
 0x6bf   :  { %v763_v46 = vadd.f32 %v759_v45, %v149_v44 }
 0x6c0   :  { %v1319_v47 = vpop.f32.mrf.mxu1 }
 0x6c1   :  { %1377 = vtanh.f32 %v763_v46 }
 0x6ce   :  { %v1378_v48 = vpop.eup %1377 }
 0x6cf   :  { %1353 = vmatmul.mubr.f32.vlgmr.msra.gmra.mxu0 %v1378_v48 }
 0x78f   :  { %v854_v50 = vpop.f32.mrf.mxu0 }
 0x790   :  { %v855_v51 = vadd.f32 %v886_v49, %v854_v50 }
 0x791   :  { %v1354_v52 = vpop.f32.mrf.mxu0 }
 0x792   :  { %858 = vmax.xlane.f32.xlu0 %v855_v51 }
 0x81b   :  { %v859_v0 = vpop.xlane.xlu0 %858 }
 0x81c   :  { %v860_v53 = vsub.f32 %v855_v51, %v859_v0 }
 0x81e   :  { %v861_v54 = vmul.f32 1.442695, %v860_v53 }
 0x820   :  { %1379 = vpow2.f32 %v861_v54 }
 0x82d   :  { %v1380_v24 = vpop.eup %1379 }
 0x82e   :  { %863 = vadd.xlane.f32.xlu1 %v1380_v24 }
 0x8b7   :  { %v864_v27 = vpop.xlane.xlu1 %863 }
 0x8b8   :  { %1381 = vrcp.f32 %v864_v27 }
 0x8c5   :  { %v1382_v55 = vpop.eup %1381 }
 0x8c6   :  { %v866_v56 = vmul.f32 %v1382_v55, %v1380_v24 }
 0x8c8   :  { %867 = vst [vmem:[#allocation9] sm:$0xff] %v866_v56 }
 0x8c9   :  { %1454 = shalt.err (!%p1451_p5)
}
 0x8ca   :  { %877 = dma.vmem_to_hbm [thread:$0]  %s875_s16, 128, %s1902_s6, [#allocation5]  }
 0x8cb   :  { %1467 = dma.done.wait [#allocation5], 128  }
 0x8cc   :  { %1468 = vsyncadd [#allocation5], 4294967168 }
 0x8cd   :  { %881 = vsyncpa [#allocation4], 1 }
 0x8ce   :  { %882 = vsyncpa [#allocation7], 1 }
 0x8cf   :  { %883 = vsyncpa [#allocation5], 1 }

</bundles_post_ra>
